<compile_context>
chip_gen: v7x
topology: tpu7x:2x2x1
jax: 0.10.0
libtpu: 0.0.40
codegen_flags: <defaults>
</compile_context>

<pallas_src>
import functools

import jax
import jax.numpy as jnp
from jax import lax
from jax.experimental import pallas as pl
from jax.experimental.pallas import tpu as pltpu

EPS = 1e-8  # nn.CosineSimilarity default eps


def _round_up(x: int, m: int) -> int:
    return (x + m - 1) // m * m


# ---------------------------------------------------------------------------
# Pass 1: row-wise L2 normalization (done once, not per output tile).
# ---------------------------------------------------------------------------
def _normalize_kernel(x_ref, o_ref):
    x = x_ref[...].astype(jnp.float32)
    ssq = jnp.sum(x * x, axis=-1, keepdims=True)
    # max(sqrt(s), eps) == sqrt(max(s, eps^2)); rsqrt goes to the EUP slot.
    inv = lax.rsqrt(jnp.maximum(ssq, jnp.float32(EPS * EPS)))
    o_ref[...] = (x * inv).astype(o_ref.dtype)


def _l2_normalize_rows(x, block_rows: int):
    m, d = x.shape
    assert m % block_rows == 0
    return pl.pallas_call(
        _normalize_kernel,
        out_shape=jax.ShapeDtypeStruct((m, d), x.dtype),
        grid=(m // block_rows,),
        in_specs=[pl.BlockSpec((block_rows, d), lambda i: (i, 0))],
        out_specs=pl.BlockSpec((block_rows, d), lambda i: (i, 0)),
        compiler_params=pltpu.CompilerParams(
            dimension_semantics=("parallel",)),
    )(x)


# ---------------------------------------------------------------------------
# Pass 2: tiled masked matmul over the (2N, 2N) score matrix.
# ---------------------------------------------------------------------------
def _scores_kernel(l_ref, r_ref, o_ref, *, inv_t, n_diag, tm, tn):
    ln = l_ref[...]                               # (tm, Dp), input dtype
    rn = r_ref[...]                               # (tn, Dp), input dtype
    # cos-sim tile = Ln @ Rn^T (contract the embedding dim of both operands).
    sim = lax.dot_general(
        ln, rn, (((1,), (1,)), ((), ())),
        preferred_element_type=jnp.float32) * jnp.float32(inv_t)

    row0 = pl.program_id(0) * tm
    col0 = pl.program_id(1) * tn
    d0 = row0 - col0
    lo = d0 - (tn - 1)
    hi = d0 + (tm - 1)
    # Does this tile intersect the row-col == +/-N off-diagonals?
    has_diag = ((lo <= n_diag) & (n_diag <= hi)) | \
               ((lo <= -n_diag) & (-n_diag <= hi))

    @pl.when(has_diag)
    def _():
        row = lax.broadcasted_iota(jnp.int32, (tm, tn), 0) + row0
        col = lax.broadcasted_iota(jnp.int32, (tm, tn), 1) + col0
        o_ref[...] = jnp.where(jnp.abs(row - col) == n_diag,
                               jnp.float32(-jnp.inf), sim)

    @pl.when(jnp.logical_not(has_diag))
    def _():
        o_ref[...] = sim


# ---------------------------------------------------------------------------
# Wrapper
# ---------------------------------------------------------------------------
def linear_critic(z1, z2, temperature: float = 1.0, *,
                  block_m: int = 256, block_n: int = 256):
    """Pallas implementation of LinearCritic.forward for (N, D) inputs."""
    # TODO(synk): extra leading batch dims of the PyTorch module are not
    # implemented here (vmap this wrapper if needed).
    assert z1.shape == z2.shape and z1.ndim == 2
    n, d = z1.shape
    two_n = 2 * n

    # Zero-pad the contraction dim to a multiple of 128 (does not change
    # norms or dot products) so the MXU runs at full depth.
    d_pad = _round_up(d, 128)

    # Lane-dense output tiles: multiple of 128 in N, 8-aligned in M.
    tm = min(block_m, _round_up(two_n, 8))
    tn = min(block_n, _round_up(two_n, 128))
    m_pad = _round_up(two_n, tm)
    n_pad = _round_up(two_n, tn)

    def _prep(a, b, rows_pad):
        x = jnp.concatenate([a, b], axis=0)
        return jnp.pad(x, ((0, rows_pad - two_n), (0, d_pad - d)))

    # Rows of raw_scores index [z1; z2]; columns index [z2; z1].
    l = _prep(z1, z2, m_pad)
    r = _prep(z2, z1, n_pad)

    # One-shot normalization (padded zero rows stay zero; sliced off below).
    ln = _l2_normalize_rows(l, tm)
    rn = _l2_normalize_rows(r, tn)

    kernel = functools.partial(
        _scores_kernel, inv_t=float(1.0 / temperature),
        n_diag=n, tm=tm, tn=tn)

    scores = pl.pallas_call(
        kernel,
        out_shape=jax.ShapeDtypeStruct((m_pad, n_pad), jnp.float32),
        grid=(m_pad // tm, n_pad // tn),
        in_specs=[
            pl.BlockSpec((tm, d_pad), lambda i, j: (i, 0)),
            pl.BlockSpec((tn, d_pad), lambda i, j: (j, 0)),
        ],
        out_specs=pl.BlockSpec((tm, tn), lambda i, j: (i, j)),
        compiler_params=pltpu.CompilerParams(
            dimension_semantics=("parallel", "parallel")),
    )(ln, rn)

    raw_scores = scores[:two_n, :two_n]
    # PyTorch uses int64; JAX defaults to int32 (x64 disabled).
    targets = jnp.arange(two_n, dtype=jnp.int32)
    return raw_scores, targets


# ---------------------------------------------------------------------------
# Pure-JAX reference for correctness checking.
# ---------------------------------------------------------------------------
def _reference(z1, z2, temperature: float = 1.0):
    def norm(z):
        ssq = jnp.sum(z * z, axis=-1, keepdims=True)
        return z * lax.rsqrt(jnp.maximum(ssq, EPS * EPS))
    z1n, z2n = norm(z1), norm(z2)
    sim11 = z1n @ z1n.T / temperature
    sim22 = z2n @ z2n.T / temperature
    sim12 = z1n @ z2n.T / temperature
    m = sim12.shape[-1]
    eye = jnp.eye(m, dtype=bool)
    sim11 = jnp.where(eye, -jnp.inf, sim11)
    sim22 = jnp.where(eye, -jnp.inf, sim22)
    top = jnp.concatenate([sim12, sim11], axis=-1)
    bot = jnp.concatenate([sim22, sim12.T], axis=-1)
    return (jnp.concatenate([top, bot], axis=-2),
            jnp.arange(2 * m, dtype=jnp.int32))


if __name__ == "__main__":
    key = jax.random.PRNGKey(0)
    k1, k2 = jax.random.split(key)
    N, D = 8, 32
    z1 = jax.random.normal(k1, (N, D), dtype=jnp.float32)
    z2 = jax.random.normal(k2, (N, D), dtype=jnp.float32)
    T = 0.5

    raw_scores, targets = linear_critic(z1, z2, temperature=T)
    jax.block_until_ready(raw_scores)
    jax.block_until_ready(targets)

    ref_scores, ref_targets = _reference(z1, z2, temperature=T)

    assert raw_scores.shape == (2 * N, 2 * N)
    assert targets.shape == (2 * N,)
    # -inf positions must match exactly; finite entries to a tolerance that
    # allows for MXU f32-matmul rounding differences vs. the XLA reference.
    finite = jnp.isfinite(ref_scores)
    assert bool(jnp.all(jnp.isfinite(raw_scores) == finite))
    assert bool(jnp.allclose(jnp.where(finite, raw_scores, 0.0),
                             jnp.where(finite, ref_scores, 0.0),
                             atol=2e-3, rtol=2e-3))
    assert bool(jnp.all(targets == ref_targets))

    print("KERNEL_OK")
</pallas_src>

<mosaic_0001>
module attributes {stable_mosaic.version = 11 : i64} {
  func.func @_normalize_kernel(%arg0: i32, %arg1: memref<16x128xf32, #tpu.memory_space<vmem>>, %arg2: memref<16x128xf32, #tpu.memory_space<vmem>>) attributes {dimension_semantics = [#tpu.dimension_semantics<parallel>], iteration_bounds = array<i64: 1>, scalar_prefetch = 0 : i64, scratch_operands = 0 : i64, tpu.core_type = #tpu.core_type<tc>, window_params = [{transform_indices = @transform_0, window_bounds = array<i64: 16, 128>}, {transform_indices = @transform_1, window_bounds = array<i64: 16, 128>}]} {
    %c0 = arith.constant 0 : index
    %c0_0 = arith.constant 0 : index
    %0 = vector.load %arg1[%c0, %c0_0] : memref<16x128xf32, #tpu.memory_space<vmem>>, vector<16x128xf32>
    %1 = arith.mulf %0, %0 : vector<16x128xf32>
    %cst = arith.constant dense<0.000000e+00> : vector<16xf32>
    %2 = vector.multi_reduction <add>, %1, %cst [1] : vector<16x128xf32> to vector<16xf32>
    %3 = vector.shape_cast %2 : vector<16xf32> to vector<16x1xf32>
    %cst_1 = arith.constant 1.000000e-16 : f32
    %4 = vector.broadcast %cst_1 : f32 to vector<16x1xf32>
    %5 = arith.maximumf %3, %4 : vector<16x1xf32>
    %6 = math.rsqrt %5 : vector<16x1xf32>
    %7 = vector.broadcast %6 : vector<16x1xf32> to vector<16x128xf32>
    %8 = arith.mulf %0, %7 : vector<16x128xf32>
    %c0_2 = arith.constant 0 : index
    %c0_3 = arith.constant 0 : index
    %9 = vector.load %arg2[%c0_2, %c0_3] : memref<16x128xf32, #tpu.memory_space<vmem>>, vector<16x128xf32>
    tpu.vector_store %arg2[%c0_2, %c0_3], %8 {strides = array<i32>} : memref<16x128xf32, #tpu.memory_space<vmem>>, vector<16x128xf32>,
    return
  }
  func.func @transform_0(%arg0: i32) -> (i32, i32) {
    %c0_i32 = arith.constant 0 : i32
    %c0_i32_0 = arith.constant 0 : i32
    return %arg0, %c0_i32 : i32, i32
  }
  func.func @transform_1(%arg0: i32) -> (i32, i32) {
    %c0_i32 = arith.constant 0 : i32
    %c0_i32_0 = arith.constant 0 : i32
    return %arg0, %c0_i32 : i32, i32
  }
}

</mosaic_0001>

<bundles_post_ra>
// kernel: tpu_custom_call.1
= control target key start
LH: loop header
LB: loop body
LE: loop exit
PB: predicated region body
PF: predicated region fallthrough
CT: control target
= control target key end

     0   :  { %6 = vsyncpa [#allocation3], 0  ;;  %s156_s0 = inlined_call_operand.hbm [shape: f32[16,128], index: 0, kind: input, shape index: {}]   ;;  %s157_s1 = inlined_call_operand.hbm [shape: f32[16,128], index: 1, kind: output, shape index: {}]  }
   0x1   :  { %7 = vsyncpa [#allocation4], 0  ;;  %s112_s6 = smov [#allocation2]   ;;  %s64_s10 = scalar_lea.hbm %s156_s0, 256 }
   0x2   :  { %s13_s7 = sshll.u32 %s112_s6, 4  ;;  %p65_p0 = scmp.ne.s32.totalorder %s156_s0, %s64_s10  ;;  %s14_s7 = int_to_ptr.vmem [resolvable:$true] %s13_s7 }
   0x3   :  { %p68_p1 = scmp.lt.u32.totalorder %s64_s10, %s156_s0 }
   0x5   :  { %p70_p2 = pnand %p68_p1, %p65_p0 }
   0x7   :  { %73 = shalt.err (!%p70_p2)
}
   0x8   :  { %s74_s15 = scalar_lea.vmem %s14_s7, 256  ;;  %p79_p4 = scmp.lt.s32.totalorder %s14_s7, %s14_s7 }
   0x9   :  { %p75_p3 = scmp.ne.s32.totalorder %s14_s7, %s74_s15  ;;  %p80_p5 = scmp.lt.s32.totalorder %s74_s15, %s74_s15 }
   0xb   :  { %p81_p6 = por %p80_p5, %p79_p4 }
   0xd   :  { %p82_p7 = pnand %p81_p6, %p75_p3 }
   0xf   :  { %85 = shalt.err (!%p82_p7)
}
  0x10   :  { %s113_s16 = smov 128   ;;  %s114_s17 = smov 8  }
  0x11   :  { %19 = dma.hbm_to_vmem [thread:$0]  %s156_s0, 256, %s14_s7, [#allocation3], %s113_s16, %s113_s16, %s114_s17  }
  0x12   :  { %108 = dma.done.wait [#allocation3], 256  }
  0x13   :  { %109 = vsyncadd [#allocation3], 4294967040  ;;  %v23_v0 = vld [vmem:[#allocation2] sm:$0xff]  ;;  %v24_v1 = vld [vmem:[#allocation2 + $0x8] sm:$0xff]  ;;  %s115_s20 = smov [#allocation5]  }
  0x14   :  { %v25_v2 = vmul.f32 %v23_v0, %v23_v0  ;;  %v26_v3 = vmul.f32 %v24_v1, %v24_v1  ;;  %s44_s21 = sshll.u32 %s115_s20, 4  ;;  %s45_s21 = int_to_ptr.vmem [resolvable:$true] %s44_s21 }
  0x15   :  { %s86_s0 = scalar_lea.vmem %s45_s21, 256  ;;  %p91_p9 = scmp.lt.s32.totalorder %s45_s21, %s45_s21 }
  0x16   :  { %27 = vadd.xlane.f32.xlu0 %v25_v2  ;;  %p87_p8 = scmp.ne.s32.totalorder %s45_s21, %s86_s0  ;;  %p92_p10 = scmp.lt.s32.totalorder %s86_s0, %s86_s0 }
  0x18   :  { %p93_p11 = por %p92_p10, %p91_p9 }
  0x1a   :  { %29 = vadd.xlane.f32.xlu0 %v26_v3  ;;  %p94_p12 = pnand %p93_p11, %p87_p8 }
  0xa3   :  { %v28_v4 = vpop.xlane.xlu0 %27 }
  0xa4   :  { %v31_v5 = vmax.f32 %v28_v4, 1e-16 }
  0xa6   :  { %60 = vrsqrt.f32 %v31_v5 }
  0xa7   :  { %v30_v6 = vpop.xlane.xlu0 %29 }
  0xa8   :  { %v32_v7 = vmax.f32 %v30_v6, 1e-16 }
  0xaa   :  { %62 = vrsqrt.f32 %v32_v7 }
  0xb0   :  { %v61_v8 = vpop.eup %60 }
  0xb1   :  { %v35_v9 = vmul.f32 %v61_v8, %v23_v0 }
  0xb3   :  { %37 = vst [vmem:[#allocation5] sm:$0xff] %v35_v9 }
  0xb4   :  { %v63_v10 = vpop.eup %62 }
  0xb5   :  { %v36_v11 = vmul.f32 %v63_v10, %v24_v1 }
  0xb7   :  { %38 = vst [vmem:[#allocation5 + $0x8] sm:$0xff] %v36_v11 }
  0xb8   :  { %97 = shalt.err (!%p94_p12)
}
  0xb9   :  { %s98_s24 = scalar_lea.hbm %s157_s1, 256 }
  0xba   :  { %p99_p13 = scmp.ne.s32.totalorder %s157_s1, %s98_s24  ;;  %p102_p0 = scmp.lt.u32.totalorder %s98_s24, %s157_s1 }
  0xbc   :  { %p104_p1 = pnand %p102_p0, %p99_p13 }
  0xbe   :  { %107 = shalt.err (!%p104_p1)
}
  0xbf   :  { %50 = dma.vmem_to_hbm [thread:$0]  %s45_s21, 256, %s157_s1, [#allocation4], %s113_s16, %s113_s16, %s114_s17  }
  0xc0   :  { %110 = dma.done.wait [#allocation4], 256  }
  0xc1   :  { %111 = vsyncadd [#allocation4], 4294967040 }
  0xc2   :  { %54 = vsyncpa [#allocation3], 1 }
  0xc3   :  { %55 = vsyncpa [#allocation4], 1 }

</bundles_post_ra>
